<compile_context>
chip_gen: v5e
topology: v5e:2x2
jax: 0.10.0
libtpu: 0.0.40
codegen_flags: <defaults>
</compile_context>

<pallas_src>
import functools

import jax
import jax.numpy as jnp
from jax.experimental import pallas as pl
from jax.experimental.pallas import tpu as pltpu


def _round_up(n, m):
    return ((n + m - 1) // m) * m


def node_model_kernel(nb_ref, eb_ref,                      # scalar prefetch (SMEM)
                      x_ref, dest_ref, ea_ref,             # streamed inputs
                      w0x_ref, w0m_ref, b0_ref, wh_ref, bh_ref,   # resident weights
                      out_ref,                             # output
                      acc_sum_ref, acc_cnt_ref,            # scratch
                      *, n_hidden, tec):
    step = pl.program_id(0)
    last_step = pl.num_programs(0) - 1
    tn = acc_sum_ref.shape[0]
    te = ea_ref.shape[0]
    n_chunks = te // tec

    nb = nb_ref[step]                                   # node-block id of this step
    prev_nb = nb_ref[jnp.maximum(step - 1, 0)]
    next_nb = nb_ref[jnp.minimum(step + 1, last_step)]
    is_first = jnp.logical_or(step == 0, prev_nb != nb)  # first step of this node tile
    is_last = jnp.logical_or(step == last_step, next_nb != nb)

    @pl.when(is_first)
    def _init():
        acc_sum_ref[...] = jnp.zeros_like(acc_sum_ref)
        acc_cnt_ref[...] = jnp.zeros_like(acc_cnt_ref)

    # ---- scatter-add of this edge block into the node-tile accumulator ------
    # one-hot (tn, tec) @ edge chunk (tec, D) on the MXU, chunked along the
    # edge block so the one-hot stays small; counts via XLU lane reduce.
    row_ids = nb * tn + jax.lax.broadcasted_iota(jnp.int32, (tn, tec), 0)
    part_sum = jnp.zeros((tn, acc_sum_ref.shape[1]), jnp.float32)
    part_cnt = jnp.zeros((tn, 1), jnp.float32)
    for c in range(n_chunks):                            # small static unroll
        dest_c = dest_ref[:, c * tec:(c + 1) * tec]      # (1, tec) int32
        mask = row_ids == dest_c                         # (tn, tec) bool
        onehot = mask.astype(jnp.bfloat16)               # exact 0/1 in bf16
        part_sum = part_sum + jnp.dot(
            onehot, ea_ref[c * tec:(c + 1) * tec, :],
            preferred_element_type=jnp.float32)
        part_cnt = part_cnt + jnp.sum(mask.astype(jnp.float32),
                                      axis=1, keepdims=True)
    acc_sum_ref[...] += part_sum                         # single RMW per step
    acc_cnt_ref[...] += part_cnt

    # ---- finalize: mean, concat-free first linear, hidden MLP ---------------
    @pl.when(is_last)
    def _finalize():
        counts = jnp.maximum(acc_cnt_ref[...], 1.0)      # (tn, 1)
        mean = acc_sum_ref[...] / counts                 # exact scatter_mean
        # concat([x, mean]) @ w0  ==  x @ w0[:D] + mean @ w0[D:]
        h = (jnp.dot(x_ref[...].astype(jnp.bfloat16), w0x_ref[...],
                     preferred_element_type=jnp.float32)
             + jnp.dot(mean.astype(jnp.bfloat16), w0m_ref[...],
                       preferred_element_type=jnp.float32)
             + b0_ref[...])
        if n_hidden >= 1:
            h = h * jax.nn.sigmoid(h)                    # SiLU in f32
        for k in range(n_hidden):
            h = (jnp.dot(h.astype(jnp.bfloat16), wh_ref[k],
                         preferred_element_type=jnp.float32) + bh_ref[k])
            if k < n_hidden - 1:
                h = h * jax.nn.sigmoid(h)
        out_ref[...] = h.astype(out_ref.dtype)


def node_model(x, dest, edge_attr, params, n_hidden, *, tile_n=512, tile_e=512):
    """x: (N, D) f32, dest: (E,) int, edge_attr: (E, D) f32 -> (N, D) f32."""
    N, D = x.shape
    E = edge_attr.shape[0]
    w0, b0, wh, bh = params            # (2D,D), (1,D), (H,D,D), (H,1,D)

    # ---- tiling (no feature-dim padding; block dims equal full dims are OK) -
    TN = int(min(tile_n, _round_up(N, 8)))
    Np = _round_up(N, TN)
    NT = Np // TN
    TE = _round_up(min(tile_e, _round_up(max(E, 1), 128)), 128)
    Ep = _round_up(max(E, 1), TE)
    EB = Ep // TE
    SENT = EB                          # sentinel (all-padding) edge block index
    G = NT + EB                        # static upper bound on total grid steps
    # one-hot chunk size: keep the (TN, TEC) bf16 one-hot well under the vreg file
    TEC = 256 if (TE % 256 == 0 and TN * 256 * 2 <= 128 * 1024) else 128

    # ---- sort edges by destination (one pass); pad + append sentinel block --
    order = jnp.argsort(jnp.asarray(dest, jnp.int32))
    dest_sorted = jnp.asarray(dest, jnp.int32)[order]
    ea_sorted = edge_attr[order].astype(jnp.bfloat16)
    pad_rows = (Ep + TE) - E
    # TODO(synk): dest values outside [0, N) are silently dropped here
    # (torch_scatter would raise); documented behavioral difference.
    dest_p = jnp.concatenate(
        [dest_sorted, jnp.full((pad_rows,), -1, jnp.int32)])[None, :]   # (1, Ep+TE)
    ea_p = jnp.concatenate(
        [ea_sorted, jnp.zeros((pad_rows, D), jnp.bfloat16)], axis=0)    # (Ep+TE, D)

    # ---- per-node-tile edge ranges -> flat step -> (node block, edge block) --
    tiles = jnp.arange(NT, dtype=jnp.int32)
    starts = jnp.searchsorted(dest_sorted, tiles * TN, side="left")
    ends = jnp.searchsorted(dest_sorted, (tiles + 1) * TN, side="left")
    nonempty = ends > starts
    first_blk = starts // TE
    last_blk = jnp.maximum(ends - 1, 0) // TE
    nblocks = jnp.where(nonempty, last_blk - first_blk + 1, 1).astype(jnp.int32)
    csum = jnp.cumsum(nblocks)
    step_start = jnp.concatenate([jnp.zeros((1,), jnp.int32), csum])[:NT]
    total = csum[-1]

    steps = jnp.arange(G, dtype=jnp.int32)
    nb_map = jnp.clip(jnp.searchsorted(step_start, steps, side="right") - 1,
                      0, NT - 1).astype(jnp.int32)
    within = steps - step_start[nb_map]
    eb_map = jnp.where((steps < total) & nonempty[nb_map],
                       first_blk[nb_map] + within, SENT).astype(jnp.int32)

    # ---- node features / weights (bf16 casts only; no padding passes) -------
    x_p = x if Np == N else jnp.zeros((Np, D), x.dtype).at[:N].set(x)
    w0x = w0[:D].astype(jnp.bfloat16)
    w0m = w0[D:].astype(jnp.bfloat16)
    b0_p = b0.astype(jnp.float32).reshape(1, D)
    H = max(n_hidden, 1)
    if n_hidden > 0:
        wh_p = wh.astype(jnp.bfloat16)
        bh_p = bh.astype(jnp.float32)
    else:
        wh_p = jnp.zeros((1, D, D), jnp.bfloat16)
        bh_p = jnp.zeros((1, 1, D), jnp.float32)

    # ---- VMEM tally (lane-padded) -> vmem_limit_bytes ------------------------
    Dl = _round_up(D, 128)
    TNs = _round_up(TN, 8)
    tally = (2 * TNs * Dl * 4            # x blocks (f32, double buffered)
             + 2 * 8 * TE * 4            # dest blocks
             + 2 * TE * Dl * 2           # edge blocks (bf16)
             + 2 * 2 * Dl * Dl * 2       # w0x + w0m
             + 2 * 8 * Dl * 4            # b0
             + 2 * H * Dl * Dl * 2       # hidden weights
             + 2 * H * 8 * Dl * 4        # hidden biases
             + 2 * TNs * Dl * 4          # out blocks
             + TNs * Dl * 4 + TNs * 128 * 4)   # scratch accumulators
    vmem_limit = int(min(max(2 * tally, 32 * 1024 * 1024), 64 * 1024 * 1024))

    const2 = lambda s, nb, eb: (0, 0)
    const3 = lambda s, nb, eb: (0, 0, 0)
    kernel = functools.partial(node_model_kernel, n_hidden=n_hidden, tec=TEC)

    out_p = pl.pallas_call(
        kernel,
        out_shape=jax.ShapeDtypeStruct((Np, D), jnp.float32),
        grid_spec=pltpu.PrefetchScalarGridSpec(
            num_scalar_prefetch=2,                          # nb_map, eb_map
            grid=(G,),
            in_specs=[
                pl.BlockSpec((TN, D), lambda s, nb, eb: (nb[s], 0)),   # x
                pl.BlockSpec((1, TE), lambda s, nb, eb: (0, eb[s])),   # dest (sorted)
                pl.BlockSpec((TE, D), lambda s, nb, eb: (eb[s], 0)),   # edge_attr (sorted)
                pl.BlockSpec((D, D), const2),                          # w0 (x half)   - resident
                pl.BlockSpec((D, D), const2),                          # w0 (mean half)- resident
                pl.BlockSpec((1, D), const2),                          # b0            - resident
                pl.BlockSpec((H, D, D), const3),                       # hidden weights- resident
                pl.BlockSpec((H, 1, D), const3),                       # hidden biases - resident
            ],
            out_specs=pl.BlockSpec((TN, D), lambda s, nb, eb: (nb[s], 0)),
            scratch_shapes=[pltpu.VMEM((TN, D), jnp.float32),   # per-tile edge sums
                            pltpu.VMEM((TN, 1), jnp.float32)],  # per-tile edge counts
        ),
        compiler_params=pltpu.CompilerParams(
            dimension_semantics=("arbitrary",),
            vmem_limit_bytes=vmem_limit,
        ),
    )(nb_map, eb_map, x_p, dest_p, ea_p, w0x, w0m, b0_p, wh_p, bh_p)

    return out_p[:N]


def init_params(key, dim_hidden, n_hidden):
    """Deterministic init mimicking nn.Linear default (uniform +-1/sqrt(fan_in)).

    Weights stored as (in_features, out_features) so y = x @ W + b.
    """
    D = dim_hidden
    keys = jax.random.split(key, 2 * (n_hidden + 1))
    bound0 = 1.0 / jnp.sqrt(2.0 * D)
    w0 = jax.random.uniform(keys[0], (2 * D, D), jnp.float32, -bound0, bound0)
    b0 = jax.random.uniform(keys[1], (1, D), jnp.float32, -bound0, bound0)
    bound = 1.0 / jnp.sqrt(float(D))
    wh_list, bh_list = [], []
    for k in range(n_hidden):
        wh_list.append(jax.random.uniform(keys[2 + 2 * k], (D, D), jnp.float32, -bound, bound))
        bh_list.append(jax.random.uniform(keys[3 + 2 * k], (1, D), jnp.float32, -bound, bound))
    wh = jnp.stack(wh_list) if n_hidden > 0 else jnp.zeros((0, D, D), jnp.float32)
    bh = jnp.stack(bh_list) if n_hidden > 0 else jnp.zeros((0, 1, D), jnp.float32)
    return w0, b0, wh, bh


def reference(x, dest, edge_attr, params, n_hidden, cast_dtype=None):
    """Plain-JAX reference of NodeModel.forward.

    cast_dtype=jnp.bfloat16 mirrors the kernel's mixed-precision points
    (bf16 matmul operands, f32 accumulation) for a tight comparison.
    """
    if cast_dtype is not None:
        q = lambda a: a.astype(cast_dtype).astype(jnp.float32)
    else:
        q = lambda a: a
    w0, b0, wh, bh = params
    N, D = x.shape
    sums = jnp.zeros((N, D), jnp.float32).at[dest].add(q(edge_attr))
    counts = jnp.zeros((N,), jnp.float32).at[dest].add(1.0)
    mean = sums / jnp.maximum(counts, 1.0)[:, None]
    h = q(x) @ q(w0[:D]) + q(mean) @ q(w0[D:]) + b0[0]
    if n_hidden >= 1:
        h = jax.nn.silu(h)
    for k in range(n_hidden):
        h = q(h) @ q(wh[k]) + bh[k, 0]
        if k < n_hidden - 1:
            h = jax.nn.silu(h)
    return h


if __name__ == "__main__":
    n_hidden = 2
    dim_hidden = 32
    N = 40    # number of nodes
    E = 300   # number of edges

    key = jax.random.PRNGKey(0)
    k_x, k_ea, k_dest, k_params = jax.random.split(key, 4)

    x = jax.random.normal(k_x, (N, dim_hidden), jnp.float32)
    edge_attr = jax.random.normal(k_ea, (E, dim_hidden), jnp.float32)
    dest = jax.random.randint(k_dest, (E,), 0, N, jnp.int32)
    params = init_params(k_params, dim_hidden, n_hidden)

    ref_bf16 = reference(x, dest, edge_attr, params, n_hidden, cast_dtype=jnp.bfloat16)
    ref_f32 = reference(x, dest, edge_attr, params, n_hidden)

    # Small tiles: exercises multiple node tiles, data-dependent edge-block maps,
    # boundary edge blocks shared by neighbouring node tiles, and init/finalize.
    out = node_model(x, dest, edge_attr, params, n_hidden, tile_n=16, tile_e=128)
    out = jax.block_until_ready(out)
    assert out.shape == (N, dim_hidden)
    assert jnp.allclose(out, ref_bf16, rtol=2e-2, atol=2e-2), "mismatch vs bf16-sim reference"
    assert jnp.allclose(out, ref_f32, rtol=1e-1, atol=1e-1), "mismatch vs f32 reference"

    # Default tiles: single node tile, multi-chunk one-hot path.
    out2 = node_model(x, dest, edge_attr, params, n_hidden)
    out2 = jax.block_until_ready(out2)
    assert jnp.allclose(out2, ref_bf16, rtol=2e-2, atol=2e-2), "mismatch vs bf16-sim reference (default tiles)"
    assert jnp.allclose(out2, ref_f32, rtol=1e-1, atol=1e-1), "mismatch vs f32 reference (default tiles)"

    print("KERNEL_OK")
</pallas_src>

<mosaic_0001>
module attributes {stable_mosaic.version = 11 : i64} {
  func.func @node_model_kernel(%arg0: i32, %arg1: memref<6xi32, #tpu.memory_space<smem>>, %arg2: memref<6xi32, #tpu.memory_space<smem>>, %arg3: memref<16x32xf32, #tpu.memory_space<vmem>>, %arg4: memref<1x128xi32, #tpu.memory_space<vmem>>, %arg5: memref<128x32xbf16, #tpu.memory_space<vmem>>, %arg6: memref<32x32xbf16, #tpu.memory_space<vmem>>, %arg7: memref<32x32xbf16, #tpu.memory_space<vmem>>, %arg8: memref<1x32xf32, #tpu.memory_space<vmem>>, %arg9: memref<2x32x32xbf16, #tpu.memory_space<vmem>>, %arg10: memref<2x1x32xf32, #tpu.memory_space<vmem>>, %arg11: memref<16x32xf32, #tpu.memory_space<vmem>>, %arg12: memref<16x32xf32, #tpu.memory_space<vmem>>, %arg13: memref<16x1xf32, #tpu.memory_space<vmem>>) attributes {dimension_semantics = [#tpu.dimension_semantics<arbitrary>], iteration_bounds = array<i64: 6>, scalar_prefetch = 2 : i64, scratch_operands = 2 : i64, tpu.core_type = #tpu.core_type<tc>, window_params = [{transform_indices = @transform_0, window_bounds = array<i64: 16, 32>}, {transform_indices = @transform_1, window_bounds = array<i64: 1, 128>}, {transform_indices = @transform_2, window_bounds = array<i64: 128, 32>}, {pipeline_mode = #tpu.pipeline_mode<synchronous>, transform_indices = @transform_3, window_bounds = array<i64: 32, 32>}, {pipeline_mode = #tpu.pipeline_mode<synchronous>, transform_indices = @transform_4, window_bounds = array<i64: 32, 32>}, {pipeline_mode = #tpu.pipeline_mode<synchronous>, transform_indices = @transform_5, window_bounds = array<i64: 1, 32>}, {pipeline_mode = #tpu.pipeline_mode<synchronous>, transform_indices = @transform_6, window_bounds = array<i64: 2, 32, 32>}, {pipeline_mode = #tpu.pipeline_mode<synchronous>, transform_indices = @transform_7, window_bounds = array<i64: 2, 1, 32>}, {transform_indices = @transform_8, window_bounds = array<i64: 16, 32>}]} {
    %0 = arith.index_cast %arg0 : i32 to index
    %1 = memref.load %arg1[%0] : memref<6xi32, #tpu.memory_space<smem>>
    %c1_i32 = arith.constant 1 : i32
    %2 = arith.subi %arg0, %c1_i32 : i32
    %c0_i32 = arith.constant 0 : i32
    %3 = arith.maxsi %2, %c0_i32 : i32
    %4 = arith.index_cast %3 : i32 to index
    %5 = memref.load %arg1[%4] : memref<6xi32, #tpu.memory_space<smem>>
    %c1_i32_0 = arith.constant 1 : i32
    %6 = arith.addi %arg0, %c1_i32_0 : i32
    %c5_i32 = arith.constant 5 : i32
    %7 = arith.minsi %6, %c5_i32 : i32
    %8 = arith.index_cast %7 : i32 to index
    %9 = memref.load %arg1[%8] : memref<6xi32, #tpu.memory_space<smem>>
    %c0_i32_1 = arith.constant 0 : i32
    %10 = arith.cmpi eq, %arg0, %c0_i32_1 : i32
    %11 = arith.cmpi ne, %5, %1 : i32
    %12 = arith.ori %10, %11 : i1
    %c5_i32_2 = arith.constant 5 : i32
    %13 = arith.cmpi eq, %arg0, %c5_i32_2 : i32
    %14 = arith.cmpi ne, %9, %1 : i32
    %15 = arith.ori %13, %14 : i1
    %16 = arith.extui %12 : i1 to i32
    %c0_i32_3 = arith.constant 0 : i32
    %17 = arith.cmpi ne, %16, %c0_i32_3 : i32
    scf.if %17 {
      %cst_19 = arith.constant 0.000000e+00 : f32
      %46 = vector.broadcast %cst_19 : f32 to vector<16x32xf32>
      %c0_20 = arith.constant 0 : index
      %c0_21 = arith.constant 0 : index
      %47 = vector.load %arg12[%c0_20, %c0_21] : memref<16x32xf32, #tpu.memory_space<vmem>>, vector<16x32xf32>
      tpu.vector_store %arg12[%c0_20, %c0_21], %46 {strides = array<i32>} : memref<16x32xf32, #tpu.memory_space<vmem>>, vector<16x32xf32>,
      %cst_22 = arith.constant 0.000000e+00 : f32
      %48 = vector.broadcast %cst_22 : f32 to vector<16x1xf32>
      %c0_23 = arith.constant 0 : index
      %c0_24 = arith.constant 0 : index
      %49 = vector.load %arg13[%c0_23, %c0_24] : memref<16x1xf32, #tpu.memory_space<vmem>>, vector<16x1xf32>
      tpu.vector_store %arg13[%c0_23, %c0_24], %48 {strides = array<i32>} : memref<16x1xf32, #tpu.memory_space<vmem>>, vector<16x1xf32>,
    } else {
    }
    %c16_i32 = arith.constant 16 : i32
    %18 = arith.muli %1, %c16_i32 : i32
    %19 = tpu.iota {dimensions = array<i32: 0>} : vector<16x128xi32>
    %20 = vector.broadcast %18 : i32 to vector<16x128xi32>
    %21 = arith.addi %20, %19 : vector<16x128xi32>
    %cst = arith.constant 0.000000e+00 : f32
    %22 = vector.broadcast %cst : f32 to vector<16x32xf32>
    %cst_4 = arith.constant 0.000000e+00 : f32
    %23 = vector.broadcast %cst_4 : f32 to vector<16x1xf32>
    %c0 = arith.constant 0 : index
    %c0_5 = arith.constant 0 : index
    %24 = vector.load %arg4[%c0, %c0_5] : memref<1x128xi32, #tpu.memory_space<vmem>>, vector<1x128xi32>
    %25 = vector.broadcast %24 : vector<1x128xi32> to vector<16x128xi32>
    %26 = arith.cmpi eq, %21, %25 : vector<16x128xi32>
    %27 = arith.extui %26 : vector<16x128xi1> to vector<16x128xi32>
    %28 = arith.sitofp %27 : vector<16x128xi32> to vector<16x128xf32>
    %29 = arith.truncf %28 : vector<16x128xf32> to vector<16x128xbf16>
    %c0_6 = arith.constant 0 : index
    %c0_7 = arith.constant 0 : index
    %30 = vector.load %arg5[%c0_6, %c0_7] : memref<128x32xbf16, #tpu.memory_space<vmem>>, vector<128x32xbf16>
    %cst_8 = arith.constant dense<0.000000e+00> : vector<16x32xf32>
    %31 = tpu.matmul %29, %30, %cst_8 {dimension_numbers = #tpu.dot_dimension_numbers<[1], [0], [0], [1], [0, 0, 1, 1], [], []>} : vector<16x128xbf16>, vector<128x32xbf16>, vector<16x32xf32> -> vector<16x32xf32>
    %32 = arith.addf %22, %31 : vector<16x32xf32>
    %33 = arith.extui %26 : vector<16x128xi1> to vector<16x128xi32>
    %34 = arith.sitofp %33 : vector<16x128xi32> to vector<16x128xf32>
    %cst_9 = arith.constant dense<0.000000e+00> : vector<16xf32>
    %35 = vector.multi_reduction <add>, %34, %cst_9 [1] : vector<16x128xf32> to vector<16xf32>
    %36 = vector.shape_cast %35 : vector<16xf32> to vector<16x1xf32>
    %37 = arith.addf %23, %36 : vector<16x1xf32>
    %c0_10 = arith.constant 0 : index
    %c0_11 = arith.constant 0 : index
    %38 = vector.load %arg12[%c0_10, %c0_11] : memref<16x32xf32, #tpu.memory_space<vmem>>, vector<16x32xf32>
    %39 = arith.addf %38, %32 : vector<16x32xf32>
    %c0_12 = arith.constant 0 : index
    %c0_13 = arith.constant 0 : index
    %40 = vector.load %arg12[%c0_12, %c0_13] : memref<16x32xf32, #tpu.memory_space<vmem>>, vector<16x32xf32>
    tpu.vector_store %arg12[%c0_12, %c0_13], %39 {strides = array<i32>} : memref<16x32xf32, #tpu.memory_space<vmem>>, vector<16x32xf32>,
    %c0_14 = arith.constant 0 : index
    %c0_15 = arith.constant 0 : index
    %41 = vector.load %arg13[%c0_14, %c0_15] : memref<16x1xf32, #tpu.memory_space<vmem>>, vector<16x1xf32>
    %42 = arith.addf %41, %37 : vector<16x1xf32>
    %c0_16 = arith.constant 0 : index
    %c0_17 = arith.constant 0 : index
    %43 = vector.load %arg13[%c0_16, %c0_17] : memref<16x1xf32, #tpu.memory_space<vmem>>, vector<16x1xf32>
    tpu.vector_store %arg13[%c0_16, %c0_17], %42 {strides = array<i32>} : memref<16x1xf32, #tpu.memory_space<vmem>>, vector<16x1xf32>,
    %44 = arith.extui %15 : i1 to i32
    %c0_i32_18 = arith.constant 0 : i32
    %45 = arith.cmpi ne, %44, %c0_i32_18 : i32
    scf.if %45 {
      %c0_19 = arith.constant 0 : index
      %c0_20 = arith.constant 0 : index
      %46 = vector.load %arg13[%c0_19, %c0_20] : memref<16x1xf32, #tpu.memory_space<vmem>>, vector<16x1xf32>
      %cst_21 = arith.constant 1.000000e+00 : f32
      %47 = vector.broadcast %cst_21 : f32 to vector<16x1xf32>
      %48 = arith.maximumf %46, %47 : vector<16x1xf32>
      %c0_22 = arith.constant 0 : index
      %c0_23 = arith.constant 0 : index
      %49 = vector.load %arg12[%c0_22, %c0_23] : memref<16x32xf32, #tpu.memory_space<vmem>>, vector<16x32xf32>
      %50 = vector.broadcast %48 : vector<16x1xf32> to vector<16x32xf32>
      %51 = arith.divf %49, %50 : vector<16x32xf32>
      %c0_24 = arith.constant 0 : index
      %c0_25 = arith.constant 0 : index
      %52 = vector.load %arg3[%c0_24, %c0_25] : memref<16x32xf32, #tpu.memory_space<vmem>>, vector<16x32xf32>
      %53 = arith.truncf %52 : vector<16x32xf32> to vector<16x32xbf16>
      %c0_26 = arith.constant 0 : index
      %c0_27 = arith.constant 0 : index
      %54 = vector.load %arg6[%c0_26, %c0_27] : memref<32x32xbf16, #tpu.memory_space<vmem>>, vector<32x32xbf16>
      %cst_28 = arith.constant dense<0.000000e+00> : vector<16x32xf32>
      %55 = tpu.matmul %53, %54, %cst_28 {dimension_numbers = #tpu.dot_dimension_numbers<[1], [0], [0], [1], [0, 0, 1, 1], [], []>} : vector<16x32xbf16>, vector<32x32xbf16>, vector<16x32xf32> -> vector<16x32xf32>
      %56 = arith.truncf %51 : vector<16x32xf32> to vector<16x32xbf16>
      %c0_29 = arith.constant 0 : index
      %c0_30 = arith.constant 0 : index
      %57 = vector.load %arg7[%c0_29, %c0_30] : memref<32x32xbf16, #tpu.memory_space<vmem>>, vector<32x32xbf16>
      %cst_31 = arith.constant dense<0.000000e+00> : vector<16x32xf32>
      %58 = tpu.matmul %56, %57, %cst_31 {dimension_numbers = #tpu.dot_dimension_numbers<[1], [0], [0], [1], [0, 0, 1, 1], [], []>} : vector<16x32xbf16>, vector<32x32xbf16>, vector<16x32xf32> -> vector<16x32xf32>
      %59 = arith.addf %55, %58 : vector<16x32xf32>
      %c0_32 = arith.constant 0 : index
      %c0_33 = arith.constant 0 : index
      %60 = vector.load %arg8[%c0_32, %c0_33] : memref<1x32xf32, #tpu.memory_space<vmem>>, vector<1x32xf32>
      %61 = vector.broadcast %60 : vector<1x32xf32> to vector<16x32xf32>
      %62 = arith.addf %59, %61 : vector<16x32xf32>
      %63 = arith.negf %62 : vector<16x32xf32>
      %64 = math.exp %63 : vector<16x32xf32>
      %cst_34 = arith.constant 1.000000e+00 : f32
      %65 = vector.broadcast %cst_34 : f32 to vector<16x32xf32>
      %66 = arith.addf %65, %64 : vector<16x32xf32>
      %67 = arith.divf %65, %66 : vector<16x32xf32>
      %68 = arith.mulf %62, %67 : vector<16x32xf32>
      %69 = arith.truncf %68 : vector<16x32xf32> to vector<16x32xbf16>
      %c0_35 = arith.constant 0 : index
      %c0_36 = arith.constant 0 : index
      %c0_37 = arith.constant 0 : index
      %70 = vector.load %arg9[%c0_35, %c0_36, %c0_37] : memref<2x32x32xbf16, #tpu.memory_space<vmem>>, vector<1x32x32xbf16>
      %71 = vector.shape_cast %70 : vector<1x32x32xbf16> to vector<32x32xbf16>
      %cst_38 = arith.constant dense<0.000000e+00> : vector<16x32xf32>
      %72 = tpu.matmul %69, %71, %cst_38 {dimension_numbers = #tpu.dot_dimension_numbers<[1], [0], [0], [1], [0, 0, 1, 1], [], []>} : vector<16x32xbf16>, vector<32x32xbf16>, vector<16x32xf32> -> vector<16x32xf32>
      %c0_39 = arith.constant 0 : index
      %c0_40 = arith.constant 0 : index
      %c0_41 = arith.constant 0 : index
      %73 = vector.load %arg10[%c0_39, %c0_40, %c0_41] : memref<2x1x32xf32, #tpu.memory_space<vmem>>, vector<1x1x32xf32>
      %74 = vector.shape_cast %73 : vector<1x1x32xf32> to vector<1x32xf32>
      %75 = vector.broadcast %74 : vector<1x32xf32> to vector<16x32xf32>
      %76 = arith.addf %72, %75 : vector<16x32xf32>
      %77 = arith.negf %76 : vector<16x32xf32>
      %78 = math.exp %77 : vector<16x32xf32>
      %cst_42 = arith.constant 1.000000e+00 : f32
      %79 = vector.broadcast %cst_42 : f32 to vector<16x32xf32>
      %80 = arith.addf %79, %78 : vector<16x32xf32>
      %81 = arith.divf %79, %80 : vector<16x32xf32>
      %82 = arith.mulf %76, %81 : vector<16x32xf32>
      %83 = arith.truncf %82 : vector<16x32xf32> to vector<16x32xbf16>
      %c1 = arith.constant 1 : index
      %c0_43 = arith.constant 0 : index
      %c0_44 = arith.constant 0 : index
      %84 = vector.load %arg9[%c1, %c0_43, %c0_44] : memref<2x32x32xbf16, #tpu.memory_space<vmem>>, vector<1x32x32xbf16>
      %85 = vector.shape_cast %84 : vector<1x32x32xbf16> to vector<32x32xbf16>
      %cst_45 = arith.constant dense<0.000000e+00> : vector<16x32xf32>
      %86 = tpu.matmul %83, %85, %cst_45 {dimension_numbers = #tpu.dot_dimension_numbers<[1], [0], [0], [1], [0, 0, 1, 1], [], []>} : vector<16x32xbf16>, vector<32x32xbf16>, vector<16x32xf32> -> vector<16x32xf32>
      %c1_46 = arith.constant 1 : index
      %c0_47 = arith.constant 0 : index
      %c0_48 = arith.constant 0 : index
      %87 = vector.load %arg10[%c1_46, %c0_47, %c0_48] : memref<2x1x32xf32, #tpu.memory_space<vmem>>, vector<1x1x32xf32>
      %88 = vector.shape_cast %87 : vector<1x1x32xf32> to vector<1x32xf32>
      %89 = vector.broadcast %88 : vector<1x32xf32> to vector<16x32xf32>
      %90 = arith.addf %86, %89 : vector<16x32xf32>
      %c0_49 = arith.constant 0 : index
      %c0_50 = arith.constant 0 : index
      %91 = vector.load %arg11[%c0_49, %c0_50] : memref<16x32xf32, #tpu.memory_space<vmem>>, vector<16x32xf32>
      tpu.vector_store %arg11[%c0_49, %c0_50], %90 {strides = array<i32>} : memref<16x32xf32, #tpu.memory_space<vmem>>, vector<16x32xf32>,
    } else {
    }
    return
  }
  func.func @transform_0(%arg0: i32, %arg1: memref<6xi32, #tpu.memory_space<smem>>, %arg2: memref<6xi32, #tpu.memory_space<smem>>) -> (i32, i32) {
    %0 = arith.index_cast %arg0 : i32 to index
    %1 = memref.load %arg1[%0] : memref<6xi32, #tpu.memory_space<smem>>
    %c0_i32 = arith.constant 0 : i32
    %c0_i32_0 = arith.constant 0 : i32
    return %1, %c0_i32 : i32, i32
  }
  func.func @transform_1(%arg0: i32, %arg1: memref<6xi32, #tpu.memory_space<smem>>, %arg2: memref<6xi32, #tpu.memory_space<smem>>) -> (i32, i32) {
    %0 = arith.index_cast %arg0 : i32 to index
    %1 = memref.load %arg2[%0] : memref<6xi32, #tpu.memory_space<smem>>
    %c0_i32 = arith.constant 0 : i32
    %c0_i32_0 = arith.constant 0 : i32
    return %c0_i32, %1 : i32, i32
  }
  func.func @transform_2(%arg0: i32, %arg1: memref<6xi32, #tpu.memory_space<smem>>, %arg2: memref<6xi32, #tpu.memory_space<smem>>) -> (i32, i32) {
    %0 = arith.index_cast %arg0 : i32 to index
    %1 = memref.load %arg2[%0] : memref<6xi32, #tpu.memory_space<smem>>
    %c0_i32 = arith.constant 0 : i32
    %c0_i32_0 = arith.constant 0 : i32
    return %1, %c0_i32 : i32, i32
  }
  func.func @transform_3(%arg0: i32, %arg1: memref<6xi32, #tpu.memory_space<smem>>, %arg2: memref<6xi32, #tpu.memory_space<smem>>) -> (i32, i32) {
    %c0_i32 = arith.constant 0 : i32
    %c0_i32_0 = arith.constant 0 : i32
    %c0_i32_1 = arith.constant 0 : i32
    return %c0_i32, %c0_i32_0 : i32, i32
  }
  func.func @transform_4(%arg0: i32, %arg1: memref<6xi32, #tpu.memory_space<smem>>, %arg2: memref<6xi32, #tpu.memory_space<smem>>) -> (i32, i32) {
    %c0_i32 = arith.constant 0 : i32
    %c0_i32_0 = arith.constant 0 : i32
    %c0_i32_1 = arith.constant 0 : i32
    return %c0_i32, %c0_i32_0 : i32, i32
  }
  func.func @transform_5(%arg0: i32, %arg1: memref<6xi32, #tpu.memory_space<smem>>, %arg2: memref<6xi32, #tpu.memory_space<smem>>) -> (i32, i32) {
    %c0_i32 = arith.constant 0 : i32
    %c0_i32_0 = arith.constant 0 : i32
    %c0_i32_1 = arith.constant 0 : i32
    return %c0_i32, %c0_i32_0 : i32, i32
  }
  func.func @transform_6(%arg0: i32, %arg1: memref<6xi32, #tpu.memory_space<smem>>, %arg2: memref<6xi32, #tpu.memory_space<smem>>) -> (i32, i32, i32) {
    %c0_i32 = arith.constant 0 : i32
    %c0_i32_0 = arith.constant 0 : i32
    %c0_i32_1 = arith.constant 0 : i32
    %c0_i32_2 = arith.constant 0 : i32
    return %c0_i32, %c0_i32_0, %c0_i32_1 : i32, i32, i32
  }
  func.func @transform_7(%arg0: i32, %arg1: memref<6xi32, #tpu.memory_space<smem>>, %arg2: memref<6xi32, #tpu.memory_space<smem>>) -> (i32, i32, i32) {
    %c0_i32 = arith.constant 0 : i32
    %c0_i32_0 = arith.constant 0 : i32
    %c0_i32_1 = arith.constant 0 : i32
    %c0_i32_2 = arith.constant 0 : i32
    return %c0_i32, %c0_i32_0, %c0_i32_1 : i32, i32, i32
  }
  func.func @transform_8(%arg0: i32, %arg1: memref<6xi32, #tpu.memory_space<smem>>, %arg2: memref<6xi32, #tpu.memory_space<smem>>) -> (i32, i32) {
    %0 = arith.index_cast %arg0 : i32 to index
    %1 = memref.load %arg1[%0] : memref<6xi32, #tpu.memory_space<smem>>
    %c0_i32 = arith.constant 0 : i32
    %c0_i32_0 = arith.constant 0 : i32
    return %1, %c0_i32 : i32, i32
  }
}

</mosaic_0001>

<bundles_post_ra>
// kernel: tpu_custom_call.1
= control target key start
LH: loop header
LB: loop body
LE: loop exit
PB: predicated region body
PF: predicated region fallthrough
CT: control target
= control target key end

     0   :  { %s1075_s19 = smov [#allocation5]   ;;  %s1076_s20 = smov [#allocation6]   ;;  %s1264_s0 = inlined_call_operand.vmem [shape: s32[6], index: 0, kind: input, shape index: {}]   ;;  %s1265_s2 = inlined_call_operand.vmem [shape: f32[48,32], index: 2, kind: input, shape index: {}]   ;;  %s1266_s3 = inlined_call_operand.vmem [shape: s32[1,512], index: 3, kind: input, shape index: {}]   ;;  %s1267_s4 = inlined_call_operand.vmem [shape: bf16[512,32], index: 4, kind: input, shape index: {}]   ;;  %s1268_s5 = inlined_call_operand.vmem [shape: bf16[32,32], index: 5, kind: input, shape index: {}]   ;;  %s1269_s6 = inlined_call_operand.vmem [shape: bf16[32,32], index: 6, kind: input, shape index: {}]   ;;  %s1270_s7 = inlined_call_operand.vmem [shape: f32[1,32], index: 7, kind: input, shape index: {}]   ;;  %s1271_s8 = inlined_call_operand.vmem [shape: bf16[2,32,32], index: 8, kind: input, shape index: {}]   ;;  %s1272_s9 = inlined_call_operand.vmem [shape: f32[2,1,32], index: 9, kind: input, shape index: {}]   ;;  %s1273_s10 = inlined_call_operand.vmem [shape: f32[48,32], index: 10, kind: output, shape index: {}]   ;;  %s1274_s1 = inlined_call_operand.vmem [shape: s32[6], index: 1, kind: input, shape index: {}]  }
   0x1   :  { %s16_s15 = sshll.u32 %s1264_s0, 4  ;;  %s21_s18 = sshll.u32 %s1274_s1, 4  ;;  %s17_s15 = int_to_ptr.vmem [resolvable:$true] %s16_s15  ;;  %s22_s18 = int_to_ptr.vmem [resolvable:$true] %s21_s18 }
   0x2   :  { %19 = dma.vmem_to_smem %s17_s15, 16, %s1075_s19, [#allocation4] }
   0x3   :  { %24 = dma.vmem_to_smem %s22_s18, 16, %s1076_s20, [#allocation4] }
   0x4   :  { %1069 = dma.done.wait [#allocation4], 32 }
   0x5   :  { %1070 = vsyncadd [#allocation4], 4294967264 }
   0x6   :  { %27 = sfence }
   0x7   :  { %s1142_s21 = smov 0  }
   0x8 LB: > { %s1148_s0 = sadd.s32 4294967295, %s1073_s21   ;;  %p894_p0 = scmp.ge.s32.totalorder %s1073_s21, 1  ;;  %s1073_s21 = sphi %s1142_s21, %s33_s21  }
   0x9   : > { %p311_p1 = scmp.lt.s32.totalorder %s1073_s21, 7 }
   0xb   : > { %p312_p2 = pnand %p894_p0, %p311_p1 }
   0xc   : > { %s357_s1 = sld [smem:[#allocation5 + %s1148_s0]] (!%p312_p2)  ;;  %s901_s22 = sadd.s32 (!%p312_p2), 4294967295, %s1148_s0 }
   0xd   : > { %315 = sbr.rel (%p312_p2) target bundleno = 805 (0x325), region = 52  ;;  %s365_s23 = sld [smem:[#allocation6 + %s1148_s0]] (!%p312_p2) }
   0xe   : > { %p389_p3 = scmp.gt.s32.totalorder (!%p312_p2), %s901_s22, 0  ;;  %s370_s24 = sld [smem:[#allocation6 + %s1148_s0]] (!%p312_p2) }
   0xf   : > { %s392_s25 = sadd.s32 (!%p312_p2), 1, %s1148_s0  ;;  %s378_s26 = sld [smem:[#allocation5 + %s1148_s0]] (!%p312_p2) }
  0x10   : > { %s1159_s27 = sld [smem:[#allocation5 + %s1148_s0]] (!%p312_p2)  ;;  %p1161_p4 = scmp.lt.s32.totalorder (!%p312_p2), %s392_s25, 5 }
  0x11   : > { %p396_p5 = scmp.eq.s32.totalorder (!%p312_p2), %s1148_s0, 0  ;;  %p399_p12 = scmp.eq.s32.totalorder (!%p312_p2), %s1148_s0, 5 }
  0x12   : > { %s1278_s22 = smov (!%p389_p3, %s901_s22), 0  ;;  %s895_s29 = sshll.u32 %s357_s1, 1 }
  0x13   : > { %p359_p6 = scmp.lt.s32.totalorder %s895_s29, 5  ;;  %p366_p7 = scmp.lt.s32.totalorder %s365_s23, 3 }
  0x14   : > { %s897_s30 = sshll.u32 %s370_s24, 4  ;;  %s391_s11 = sld [smem:[#allocation5 + %s1278_s22]] }
  0x15   : > { %s1280_s29 = smov (!%p359_p6, %s895_s29), 5  ;;  %s1282_s23 = smov (!%p366_p7, %s365_s23), 3 }
  0x16   : > { %s896_s12 = sshll.u32 %s1280_s29, 3  ;;  %p372_p8 = scmp.lt.s32.totalorder %s897_s30, 63 }
  0x17   : > { %s1171_s15 = scalar_lea.vmem %s1265_s2, %s896_s12  ;;  %s368_s18 = scalar_lea.vmem %s1266_s3, %s1282_s23 }
  0x18   : > { %s1284_s30 = smov (!%p372_p8, %s897_s30), 63  ;;  %s899_s19 = sshll.u32 %s378_s26, 1 }
  0x19   : > { %s898_s20 = sshll.u32 %s1284_s30, 2  ;;  %p380_p10 = scmp.lt.s32.totalorder %s899_s19, 5 }
  0x1a   : > { %p397_p9 = scmp.ne.s32.totalorder %s391_s11, %s1159_s27  ;;  %s1181_s24 = scalar_lea.vmem %s1267_s4, %s898_s20 }
  0x1b   : > { %s1286_s19 = smov (!%p380_p10, %s899_s19), 5  ;;  %s1288_s25 = smov (!%p1161_p4, %s392_s25), 5 }
  0x1c   : > { %p398_p11 = por %p397_p9, %p396_p5  ;;  %s900_s29 = sshll.u32 %s1286_s19, 3 }
  0x1d   : > { %s1190_s14 = scalar_lea.vmem %s1273_s10, %s900_s29  ;;  %s395_s26 = sld [smem:[#allocation5 + %s1288_s25]]  ;;  %vm405_vm0 = vcmask (%p398_p11), 261120   ;;  %vm408_vm1 = vcmask (%p398_p11), 7168   ;;  %v1077_v0 = vmov (%p398_p11), 0.0  }
  0x1e   : > { %406 = vst.msk [vmem:[#allocation2] sm:$0xff] (%p398_p11), %vm405_vm0, %v1077_v0 }
  0x1f   : > { %407 = vst.msk [vmem:[#allocation2 + $0x8] sm:$0xff] (%p398_p11), %vm405_vm0, %v1077_v0 }
  0x20   : > { %409 = vst.msk [vmem:[#allocation3] sm:$0xff] (%p398_p11), %vm408_vm1, %v1077_v0 }
  0x21   : > { %404 = sbr.rel (!%p398_p11) target bundleno = 38 (0x26), region = 56  ;;  %410 = vst.msk [vmem:[#allocation3 + $0x8] sm:$0xff] (%p398_p11), %vm408_vm1, %v1077_v0 }
  0x23   : > { %p400_p13 = scmp.ne.s32.totalorder %s395_s26, %s1159_s27 }
  0x25   : > { %p1194_p0 = por %p400_p13, %p399_p12 }
  0x26 PF: > { %v993_v1 = vld [vmem:[%s1181_s24 + $0x38] sm:$0xff]  ;;  %s902_s0 = sshll.u32 %s1159_s27, 4  ;;  %v412_v2 = vlaneseq  ;;  %v992_v4 = vld [vmem:[%s1181_s24 + $0x30] sm:$0xff]  ;;  %v1016_v6 = vld [vmem:[%s368_s18] ss:$0 sm:$0xff]  ;;  %v1078_v10 = vmov 0.0  }
  0x27   : > { %v415_v3 = vstv %s902_s0  ;;  %491 = vmatpush.bf16.msra.mxu0 %v993_v1  ;;  %v991_v9 = vld [vmem:[%s1181_s24 + $0x28] sm:$0xff]  ;;  %v990_v13 = vld [vmem:[%s1181_s24 + $0x20] sm:$0xff]  ;;  %v989_v15 = vld [vmem:[%s1181_s24 + $0x18] sm:$0xff]  ;;  %v1079_v19 = vmov 1.0|1.0   ;;  %vm522_vm5 = vcmask 7168  }
  0x28   : > { %v413_v5 = vshrl.u32 %v412_v2, 7  ;;  %v988_v16 = vld [vmem:[%s1181_s24 + $0x10] sm:$0xff]  ;;  %v987_v17 = vld [vmem:[%s1181_s24 + $0x8] sm:$0xff]  ;;  %v986_v18 = vld [vmem:[%s1181_s24] sm:$0xff]  ;;  %vm515_vm6 = vcmask 261120   ;;  %v1080_v33 = vmov (%p1194_p0), 0  }
  0x29   : > { %v518_v20 = vld [vmem:[#allocation3] sm:$0xff]  ;;  %v519_v23 = vld [vmem:[#allocation3 + $0x8] sm:$0xff]  ;;  %v511_v26 = vld [vmem:[#allocation2] sm:$0xff]  ;;  %1017 = vset.pattern.permute.xlu0 (%p1194_p0), %v1080_v33 }
  0x2a   : > { %v414_v7 = vadd.s32 8, %v413_v5  ;;  %v416_v8 = vadd.s32 %v415_v3, %v413_v5  ;;  %v512_v29 = vld [vmem:[#allocation2 + $0x8] sm:$0xff]  ;;  %v994_v38 = vld [vmem:[%s1268_s5] sm:$0xff] (%p1194_p0) }
  0x2b   : > { %492 = vmatpush.bf16.msra.mxu0 %v992_v4  ;;  %v995_v37 = vld [vmem:[%s1268_s5 + $0x8] sm:$0xff] (%p1194_p0)  ;;  %v574_v39 = vld [vmem:[%s1171_s15] sm:$0xff] (%p1194_p0) }
  0x2c   : > { %vm420_vm2 = vcmp.eq.s32.totalorder %v416_v8, %v1016_v6  ;;  %v417_v12 = vadd.s32 %v415_v3, %v414_v7  ;;  %636 = vmatpush.bf16.msra.mxu1 (%p1194_p0), %v995_v37  ;;  %v575_v40 = vld [vmem:[%s1171_s15 + $0x8] sm:$0xff] (%p1194_p0)  ;;  %v996_v43 = vld [vmem:[%s1269_s6] sm:$0xff] (%p1194_p0) }
  0x2d   : > { %v903_v11 = vsel %vm420_vm2, 1.0, %v1078_v10  ;;  %v576_v41 = vpack.c.bf16 (%p1194_p0), %v575_v40, %v574_v39  ;;  %v997_v42 = vld [vmem:[%s1269_s6 + $0x8] sm:$0xff] (%p1194_p0)  ;;  %v998_v8 = vld [vmem:[%s1271_s8] sm:$0xff] (%p1194_p0) }
  0x2e   : > { %505 = vadd.xlane.f32.xlu0 %v903_v11  ;;  %vm421_vm3 = vcmp.eq.s32.totalorder %v417_v12, %v1016_v6  ;;  %v999_v7 = vld [vmem:[%s1271_s8 + $0x8] sm:$0xff] (%p1194_p0) }
  0x2f   : > { %493 = vmatpush.bf16.msra.mxu0 %v991_v9  ;;  %v904_v14 = vsel %vm421_vm3, 1.0, %v1078_v10  ;;  %vm937_vm4 = vmpackc.low %vm421_vm3, %vm420_vm2  ;;  %720 = vmatpush.bf16.msra.mxu2 (%p1194_p0), %v999_v7  ;;  %v1018_v10 = vld [vmem:[%s1270_s7] ss:$0 sm:$0xff] (%p1194_p0) }
  0x30   : > { %637 = vmatpush.bf16.msra.mxu1 (%p1194_p0), %v994_v38 }
  0x33   : > { %494 = vmatpush.bf16.msra.mxu0 %v990_v13  ;;  %956 = vmatmul.msk.bf16.vlgmr.msra.gmra.mxu1 (%p1194_p0), %vm515_vm6, %v576_v41 }
  0x34   : > { %721 = vmatpush.bf16.msra.mxu2 (%p1194_p0), %v998_v8 }
  0x36   : > { %507 = vadd.xlane.f32.xlu0 %v904_v14 }
  0x37   : > { %495 = vmatpush.bf16.msra.mxu0 %v989_v15 }
  0x3b   : > { %496 = vmatpush.bf16.msra.mxu0 %v988_v16 }
  0x3f   : > { %497 = vmatpush.bf16.msra.mxu0 %v987_v17 }
  0x43   : > { %498 = vmatpush.bf16.msra.mxu0 %v986_v18 }
  0x46   : > { %938 = vmatmul.msk.bf16.vlgmr.msra.gmra.mxu0 %vm937_vm4, %v1079_v19 }
  0x47   : > { %607 = vmatpush.bf16.msra.mxu0 (%p1194_p0), %v997_v42 }
  0x4b   : > { %608 = vmatpush.bf16.msra.mxu0 (%p1194_p0), %v996_v43 }
  0xa1   : > { %v506_v21 = vpop.xlane.xlu0 %505 }
  0xa2   : > { %v520_v22 = vadd.f32 %v518_v20, %v506_v21 }
  0xa4   : > { %523 = vst.msk [vmem:[#allocation3] sm:$0xff] %vm522_vm5, %v520_v22 }
  0xa9   : > { %v508_v24 = vpop.xlane.xlu0 %507 }
  0xaa   : > { %v521_v25 = vadd.f32 %v519_v23, %v508_v24 }
  0xab   : > { %v528_v32 = vld [vmem:[#allocation3] sm:$0xff] (%p1194_p0) }
  0xac   : > { %524 = vst.msk [vmem:[#allocation3 + $0x8] sm:$0xff] %vm522_vm5, %v521_v25  ;;  %v530_v34 = vmax.f32 (%p1194_p0), %v528_v32, 1.0 }
  0xae   : > { %536 = vperm.xlu0 (%p1194_p0), %1017, %v530_v34  }
  0xb0   : > { %v639_v9 = vpop.f32.mrf.mxu1 (%p1194_p0) }
  0xb3   : > { %v529_v35 = vld [vmem:[#allocation3 + $0x8] sm:$0xff] (%p1194_p0) }
  0xb4   : > { %v531_v36 = vmax.f32 (%p1194_p0), %v529_v35, 1.0 }
  0xb6   : > { %541 = vperm.xlu0 (%p1194_p0), %1017, %v531_v36  }
  0xb8   : > { %v641_v15 = vpop.f32.mrf.mxu1 (%p1194_p0) }
  0xc3   : > { %v500_v27 = vpop.f32.mrf.mxu0 }
  0xc4   : > { %v513_v28 = vadd.f32 %v511_v26, %v500_v27 }
  0xc6   : > { %516 = vst.msk [vmem:[#allocation2] sm:$0xff] %vm515_vm6, %v513_v28 }
  0xca   : > { %527 = sbr.rel (!%p1194_p0) target bundleno = 805 (0x325), region = 60 }
  0xcb   : > { %v502_v30 = vpop.f32.mrf.mxu0 }
  0xcc   : > { %v514_v31 = vadd.f32 %v512_v29, %v502_v30 }
  0xcd   : > { %v532_v63 = vld [vmem:[#allocation2] sm:$0xff] (%p1194_p0) }
  0xce   : > { %517 = vst.msk [vmem:[#allocation2 + $0x8] sm:$0xff] %vm515_vm6, %v514_v31 }
  0xd5   : > { %v533_v0 = vld [vmem:[#allocation2 + $0x8] sm:$0xff] }
 0x120   : > { %v537_v44 = vpop.permute.xlu0 %536 }
 0x121   : > { %1021 = vrcp.f32 %v537_v44  ;;  %v555_v53 = vand.u32 2147483648, %v537_v44  ;;  %vm549_vm8 = vweird.f32 %v537_v44  ;;  %v553_v55 = vand.u32 2147483647, %v537_v44 }
 0x123   : > { %v556_v60 = vor.u32 1.1754944e-38, %v555_v53  ;;  %vm554_vm12 = vcmp.eq.f32.partialorder %v553_v55, 8.507059e+37 }
 0x127   : > { %v1022_v45 = vpop.eup %1021 }
 0x128   : > { %v545_v46 = vmul.f32 %v1022_v45, %v537_v44  ;;  %v542_v47 = vpop.permute.xlu0 %541  ;;  %vm550_vm7 = vweird.f32 %v1022_v45 }
 0x129   : > { %1023 = vrcp.f32 %v542_v47  ;;  %v570_v56 = vand.u32 2147483648, %v542_v47  ;;  %vm551_vm9 = vmor %vm549_vm8, %vm550_vm7  ;;  %v568_v58 = vand.u32 2147483647, %v542_v47  ;;  %vm564_vm11 = vweird.f32 %v542_v47 }
 0x12a   : > { %v546_v48 = vsub.f32 1.0, %v545_v46 }
 0x12b   : > { %v571_v62 = vor.u32 1.1754944e-38, %v570_v56  ;;  %vm569_vm14 = vcmp.eq.f32.partialorder %v568_v58, 8.507059e+37 }
 0x12c   : > { %v547_v49 = vmul.f32 %v1022_v45, %v546_v48 }
 0x12e   : > { %v548_v52 = vadd.f32 %v1022_v45, %v547_v49 }
 0x12f   : > { %v1024_v50 = vpop.eup %1023 }
 0x130   : > { %v560_v51 = vmul.f32 %v1024_v50, %v542_v47  ;;  %vm565_vm10 = vweird.f32 %v1024_v50  ;;  %v552_v59 = vsel %vm551_vm9, %v1022_v45, %v548_v52  ;;  %v1019_v47 = vld [vmem:[%s1272_s9] ss:$0 sm:$0xff]  ;;  %v1000_v52 = vld [vmem:[%s1271_s8 + $0x10] sm:$0xff] }
 0x131   : > { %vm566_vm13 = vmor %vm564_vm11, %vm565_vm10  ;;  %v557_v1 = vsel %vm554_vm12, %v556_v60, %v552_v59 }
 0x132   : > { %v561_v54 = vsub.f32 1.0, %v560_v51  ;;  %v558_v4 = vmul.f32 %v557_v1, %v532_v63 }
 0x134   : > { %v562_v57 = vmul.f32 %v1024_v50, %v561_v54 }
 0x136   : > { %v563_v61 = vadd.f32 %v1024_v50, %v562_v57 }
 0x138   : > { %v567_v2 = vsel %vm566_vm13, %v1024_v50, %v563_v61  ;;  %v1001_v50 = vld [vmem:[%s1271_s8 + $0x18] sm:$0xff] }
 0x139   : > { %v572_v3 = vsel %vm569_vm14, %v571_v62, %v567_v2  ;;  %800 = vmatpush.bf16.msra.mxu3 %v1001_v50 }
 0x13a   : > { %v573_v5 = vmul.f32 %v572_v3, %v533_v0 }
 0x13c   : > { %v581_v6 = vpack.c.bf16 %v573_v5, %v558_v4 }
 0x13d   : > { %801 = vmatpush.bf16.msra.mxu3 %v1000_v52 }
 0x13e   : > { %947 = vmatmul.msk.bf16.vlgmr.msra.gmra.mxu0 %vm515_vm6, %v581_v6 }
 0x1bb   : > { %v610_v11 = vpop.f32.mrf.mxu0 }
 0x1bc   : > { %v640_v12 = vadd.f32 %v639_v9, %v610_v11 }
 0x1be   : > { %v648_v13 = vadd.f32 %v1018_v10, %v640_v12 }
 0x1c0   : > { %v957_v14 = vmul.f32 -1.442695, %v648_v13 }
 0x1c2   : > { %1025 = vpow2.f32 %v957_v14 }
 0x1c3   : > { %v612_v16 = vpop.f32.mrf.mxu0 }
 0x1c4   : > { %v642_v17 = vadd.f32 %v641_v15, %v612_v16 }
 0x1c6   : > { %v649_v18 = vadd.f32 %v1018_v10, %v642_v17 }
 0x1c8   : > { %v1026_v19 = vpop.eup %1025  ;;  %v958_v20 = vmul.f32 -1.442695, %v649_v18 }
 0x1c9   : > { %v656_v21 = vadd.f32 1.0, %v1026_v19  ;;  %v1020_v19 = vld [vmem:[%s1272_s9 + $0x1] ss:$0 sm:$0xff] }
 0x1ca   : > { %1027 = vpow2.f32 %v958_v20 }
 0x1cb   : > { %1029 = vrcp.f32 %v656_v21  ;;  %v669_v31 = vand.u32 2147483648, %v656_v21  ;;  %vm663_vm0 = vweird.f32 %v656_v21  ;;  %v667_v32 = vand.u32 2147483647, %v656_v21 }
 0x1cd   : > { %v670_v38 = vor.u32 1.1754944e-38, %v669_v31  ;;  %vm668_vm3 = vcmp.eq.f32.partialorder %v667_v32, 8.507059e+37 }
 0x1d0   : > { %v1028_v22 = vpop.eup %1027 }
 0x1d1   : > { %v1030_v23 = vpop.eup %1029  ;;  %v657_v24 = vadd.f32 1.0, %v1028_v22 }
 0x1d2   : > { %v659_v25 = vmul.f32 %v1030_v23, %v656_v21  ;;  %vm664_vm15 = vweird.f32 %v1030_v23 }
 0x1d3   : > { %1031 = vrcp.f32 %v657_v24  ;;  %vm665_vm1 = vmor %vm663_vm0, %vm664_vm15  ;;  %v684_v34 = vand.u32 2147483648, %v657_v24  ;;  %v682_v37 = vand.u32 2147483647, %v657_v24  ;;  %vm678_vm4 = vweird.f32 %v657_v24 }
 0x1d4   : > { %v660_v26 = vsub.f32 1.0, %v659_v25 }
 0x1d5   : > { %v685_v41 = vor.u32 1.1754944e-38, %v684_v34  ;;  %vm683_vm7 = vcmp.eq.f32.partialorder %v682_v37, 8.507059e+37 }
 0x1d6   : > { %v661_v27 = vmul.f32 %v1030_v23, %v660_v26 }
 0x1d8   : > { %v662_v29 = vadd.f32 %v1030_v23, %v661_v27 }
 0x1d9   : > { %v1032_v28 = vpop.eup %1031 }
 0x1da   : > { %v674_v30 = vmul.f32 %v1032_v28, %v657_v24  ;;  %v666_v35 = vsel %vm665_vm1, %v1030_v23, %v662_v29  ;;  %vm679_vm2 = vweird.f32 %v1032_v28 }
 0x1db   : > { %v671_v40 = vsel %vm668_vm3, %v670_v38, %v666_v35  ;;  %vm680_vm5 = vmor %vm678_vm4, %vm679_vm2 }
 0x1dc   : > { %v675_v33 = vsub.f32 1.0, %v674_v30  ;;  %v688_v44 = vmul.f32 %v671_v40, %v648_v13 }
 0x1de   : > { %v676_v36 = vmul.f32 %v1032_v28, %v675_v33 }
 0x1e0   : > { %v677_v39 = vadd.f32 %v1032_v28, %v676_v36 }
 0x1e2   : > { %v681_v42 = vsel %vm680_vm5, %v1032_v28, %v677_v39 }
 0x1e3   : > { %v686_v43 = vsel %vm683_vm7, %v685_v41, %v681_v42 }
 0x1e4   : > { %v689_v45 = vmul.f32 %v686_v43, %v649_v18 }
 0x1e6   : > { %v690_v46 = vpack.c.bf16 %v689_v45, %v688_v44 }
 0x1e8   : > { %967 = vmatmul.msk.bf16.vlgmr.msra.gmra.mxu2 %vm515_vm6, %v690_v46 }
 0x26b   : > { %v723_v48 = vpop.f32.mrf.mxu2 }
 0x26c   : > { %v724_v49 = vadd.f32 %v1019_v47, %v723_v48 }
 0x26e   : > { %v968_v51 = vmul.f32 -1.442695, %v724_v49 }
 0x270   : > { %1033 = vpow2.f32 %v968_v51 }
 0x273   : > { %v725_v53 = vpop.f32.mrf.mxu2 }
 0x274   : > { %v726_v54 = vadd.f32 %v1019_v47, %v725_v53 }
 0x276   : > { %v1034_v55 = vpop.eup %1033  ;;  %v969_v56 = vmul.f32 -1.442695, %v726_v54 }
 0x277   : > { %v734_v57 = vadd.f32 1.0, %v1034_v55 }
 0x278   : > { %1035 = vpow2.f32 %v969_v56 }
 0x279   : > { %1037 = vrcp.f32 %v734_v57  ;;  %v747_v3 = vand.u32 2147483648, %v734_v57  ;;  %vm741_vm9 = vweird.f32 %v734_v57  ;;  %v745_v4 = vand.u32 2147483647, %v734_v57 }
 0x27b   : > { %v748_v10 = vor.u32 1.1754944e-38, %v747_v3  ;;  %vm746_vm12 = vcmp.eq.f32.partialorder %v745_v4, 8.507059e+37 }
 0x27e   : > { %v1036_v58 = vpop.eup %1035 }
 0x27f   : > { %v1038_v59 = vpop.eup %1037  ;;  %v735_v60 = vadd.f32 1.0, %v1036_v58 }
 0x280   : > { %v737_v61 = vmul.f32 %v1038_v59, %v734_v57  ;;  %vm742_vm8 = vweird.f32 %v1038_v59 }
 0x281   : > { %1039 = vrcp.f32 %v735_v60  ;;  %vm743_vm10 = vmor %vm741_vm9, %vm742_vm8  ;;  %v762_v6 = vand.u32 2147483648, %v735_v60  ;;  %v760_v9 = vand.u32 2147483647, %v735_v60  ;;  %vm756_vm13 = vweird.f32 %v735_v60 }
 0x282   : > { %v738_v62 = vsub.f32 1.0, %v737_v61 }
 0x283   : > { %v763_v13 = vor.u32 1.1754944e-38, %v762_v6  ;;  %vm761_vm15 = vcmp.eq.f32.partialorder %v760_v9, 8.507059e+37 }
 0x284   : > { %v739_v63 = vmul.f32 %v1038_v59, %v738_v62 }
 0x286   : > { %v740_v1 = vadd.f32 %v1038_v59, %v739_v63 }
 0x287   : > { %v1040_v0 = vpop.eup %1039 }
 0x288   : > { %v752_v2 = vmul.f32 %v1040_v0, %v735_v60  ;;  %v744_v7 = vsel %vm743_vm10, %v1038_v59, %v740_v1  ;;  %vm757_vm11 = vweird.f32 %v1040_v0 }
 0x289   : > { %v749_v12 = vsel %vm746_vm12, %v748_v10, %v744_v7  ;;  %vm758_vm14 = vmor %vm756_vm13, %vm757_vm11 }
 0x28a   : > { %v753_v5 = vsub.f32 1.0, %v752_v2  ;;  %v766_v16 = vmul.f32 %v749_v12, %v724_v49 }
 0x28c   : > { %v754_v8 = vmul.f32 %v1040_v0, %v753_v5 }
 0x28e   : > { %v755_v11 = vadd.f32 %v1040_v0, %v754_v8 }
 0x290   : > { %v759_v14 = vsel %vm758_vm14, %v1040_v0, %v755_v11 }
 0x291   : > { %v764_v15 = vsel %vm761_vm15, %v763_v13, %v759_v14 }
 0x292   : > { %v767_v17 = vmul.f32 %v764_v15, %v726_v54 }
 0x294   : > { %v768_v18 = vpack.c.bf16 %v767_v17, %v766_v16 }
 0x296   : > { %983 = vmatmul.msk.bf16.vlgmr.msra.gmra.mxu3 %vm515_vm6, %v768_v18 }
 0x319   : > { %v803_v20 = vpop.f32.mrf.mxu3 }
 0x31a   : > { %v804_v21 = vadd.f32 %v1020_v19, %v803_v20 }
 0x31c   : > { %808 = vst.msk [vmem:[%s1190_s14] sm:$0xff] %vm515_vm6, %v804_v21 }
 0x321   : > { %v805_v22 = vpop.f32.mrf.mxu3 }
 0x322   : > { %v806_v23 = vadd.f32 %v1020_v19, %v805_v22 }
 0x324   : > { %809 = vst.msk [vmem:[%s1190_s14 + $0x8] sm:$0xff] %vm515_vm6, %v806_v23 }
 0x325 PF: > { %s33_s21 = sadd.s32 1, %s1073_s21  }
 0x326   : > { %p30_p1 = scmp.ge.s32.totalorder %s33_s21, 8  }
 0x328   :  { %32 = sbr.rel (!%p30_p1) target bundleno = 8 (0x8), region = 98 }

</bundles_post_ra>
